<compile_context>
chip_gen: v6e
topology: v6e:2x2x1
jax: 0.10.0
libtpu: 0.0.40
codegen_flags: <defaults>
</compile_context>

<pallas_src>
import jax
import jax.numpy as jnp
from jax.experimental import pallas as pl
from jax.experimental.pallas import tpu as pltpu

LN_EPS = 1e-5         # PyTorch nn.LayerNorm default
H1, H2 = 400, 300
TB_MAX = 1024         # batch tile upper bound (fits v7x 64 MiB VMEM comfortably)


def _layernorm(x, gamma, beta):
    # one-pass moments: both cross-lane reductions issue back-to-back (XLU),
    # rsqrt goes to the EUP slot. Matches nn.LayerNorm (population variance).
    s1 = jnp.mean(x, axis=-1, keepdims=True)
    s2 = jnp.mean(x * x, axis=-1, keepdims=True)
    var = jnp.maximum(s2 - s1 * s1, 0.0)
    return (x - s1) * jax.lax.rsqrt(var + LN_EPS) * gamma + beta


def critic_kernel(state_ref, action_ref,
                  w1_ref, b1_ref, g1_ref, be1_ref,
                  w2_ref, b2_ref, g2_ref, be2_ref,
                  w3_ref, b3_ref,
                  w4_ref, b4_ref,
                  out_ref):
    x = state_ref[...].astype(jnp.bfloat16)
    a = action_ref[...].astype(jnp.bfloat16)

    # func1 + norm1 + relu  (bf16 MXU, f32 accumulate; LN/relu in f32)
    h = jnp.dot(x, w1_ref[...], preferred_element_type=jnp.float32) + b1_ref[...]
    h = _layernorm(h, g1_ref[...], be1_ref[...])
    h = jnp.maximum(h, 0.0)

    # func2 + norm2
    h = jnp.dot(h.astype(jnp.bfloat16), w2_ref[...],
                preferred_element_type=jnp.float32) + b2_ref[...]
    h = _layernorm(h, g2_ref[...], be2_ref[...])

    # func3 (action branch)
    ha = jnp.dot(a, w3_ref[...], preferred_element_type=jnp.float32) + b3_ref[...]

    # feature = relu(state + action); func4 as VPU mul + lane reduce
    # (an N=1 MXU matmul would waste the whole result path for one column)
    f = jnp.maximum(h + ha, 0.0)
    q = jnp.sum(f * w4_ref[...], axis=-1, keepdims=True) + b4_ref[...]
    out_ref[...] = q.astype(out_ref.dtype)


def critic_forward(state, action, params, *, tb=TB_MAX):
    B, state_dim = state.shape
    action_dim = action.shape[1]
    TB = min(B, tb)
    grid = (pl.cdiv(B, TB),)

    # Pre-cast MXU weight operands to bf16 (halves resident weight VMEM and
    # uses the native bf16 MXU rate). Biases / LN params / final row stay f32.
    w1 = params["w1"].astype(jnp.bfloat16)
    w2 = params["w2"].astype(jnp.bfloat16)
    w3 = params["w3"].astype(jnp.bfloat16)

    args = (
        state, action,
        w1, params["b1"], params["g1"], params["be1"],
        w2, params["b2"], params["g2"], params["be2"],
        w3, params["b3"],
        params["w4"], params["b4"],
    )

    def batch_spec(feat):
        return pl.BlockSpec((TB, feat), lambda i: (i, 0))

    def resident_spec(p):
        # full-shape block, constant index: stays resident in VMEM across steps
        return pl.BlockSpec(p.shape, lambda i: (0, 0))

    in_specs = [batch_spec(state_dim), batch_spec(action_dim)] + \
               [resident_spec(p) for p in args[2:]]

    flops = 2 * B * (state_dim * H1 + H1 * H2 + action_dim * H2 + H2)
    bytes_accessed = (
        B * (state_dim + action_dim + 1) * 4
        + sum(int(p.size) * p.dtype.itemsize for p in args[2:])
    )
    cost = pl.CostEstimate(flops=flops, transcendentals=2 * B,
                           bytes_accessed=bytes_accessed)

    return pl.pallas_call(
        critic_kernel,
        out_shape=jax.ShapeDtypeStruct((B, 1), jnp.float32),
        grid=grid,
        in_specs=in_specs,
        out_specs=pl.BlockSpec((TB, 1), lambda i: (i, 0)),
        compiler_params=pltpu.CompilerParams(
            dimension_semantics=("parallel",),
            vmem_limit_bytes=64 * 1024 * 1024,
        ),
        cost_estimate=cost,
    )(*args)


def init_params(key, state_dim, action_dim):
    """Deterministic synthetic init (shapes match the PyTorch module)."""
    ks = jax.random.split(key, 8)

    def linear(kw, kb, fan_in, fan_out):
        # weights stored pre-transposed as (in, out)
        bound = 1.0 / jnp.sqrt(fan_in)
        w = jax.random.uniform(kw, (fan_in, fan_out), jnp.float32, -bound, bound)
        b = jax.random.uniform(kb, (1, fan_out), jnp.float32, -bound, bound)
        return w, b

    w1, b1 = linear(ks[0], ks[1], state_dim, H1)
    w2, b2 = linear(ks[2], ks[3], H1, H2)
    w3, b3 = linear(ks[4], ks[5], action_dim, H2)
    w4, b4 = linear(ks[6], ks[7], H2, 1)
    return {
        "w1": w1, "b1": b1,
        "g1": jnp.ones((1, H1), jnp.float32), "be1": jnp.zeros((1, H1), jnp.float32),
        "w2": w2, "b2": b2,
        "g2": jnp.ones((1, H2), jnp.float32), "be2": jnp.zeros((1, H2), jnp.float32),
        "w3": w3, "b3": b3,
        # final layer kept as a (1, 300) row for the VPU-mul + lane-reduce path
        "w4": w4.reshape(1, H2), "b4": b4,
    }


def critic_ref(state, action, p, *, bf16_matmul=True):
    """Pure-JAX reference. bf16_matmul=True mirrors the kernel's MXU precision."""
    cast = (lambda t: t.astype(jnp.bfloat16)) if bf16_matmul else (lambda t: t)
    h = jnp.dot(cast(state), cast(p["w1"]),
                preferred_element_type=jnp.float32) + p["b1"]
    h = _layernorm(h, p["g1"], p["be1"])
    h = jnp.maximum(h, 0.0)
    h = jnp.dot(cast(h), cast(p["w2"]),
                preferred_element_type=jnp.float32) + p["b2"]
    h = _layernorm(h, p["g2"], p["be2"])
    ha = jnp.dot(cast(action), cast(p["w3"]),
                 preferred_element_type=jnp.float32) + p["b3"]
    f = jnp.maximum(h + ha, 0.0)
    return jnp.sum(f * p["w4"], axis=-1, keepdims=True) + p["b4"]


if __name__ == "__main__":
    key = jax.random.PRNGKey(0)
    k_s, k_a, k_p = jax.random.split(key, 3)

    batch, state_dim, action_dim = 2, 16, 4
    state = jax.random.normal(k_s, (batch, state_dim), jnp.float32)
    action = jax.random.normal(k_a, (batch, action_dim), jnp.float32)
    params = init_params(k_p, state_dim, action_dim)

    out = critic_forward(state, action, params)
    jax.block_until_ready(out)
    assert out.shape == (batch, 1)

    # Tight check against a reference matching the kernel's bf16-MXU precision.
    ref_bf16 = critic_ref(state, action, params, bf16_matmul=True)
    assert jnp.allclose(out, ref_bf16, atol=2e-2, rtol=2e-2), (out, ref_bf16)

    # Loose semantic check against the full-f32 PyTorch-equivalent math.
    ref_f32 = critic_ref(state, action, params, bf16_matmul=False)
    assert jnp.allclose(out, ref_f32, atol=1e-1, rtol=1e-1), (out, ref_f32)

    print("KERNEL_OK")
</pallas_src>

<mosaic_0001>
module attributes {stable_mosaic.version = 11 : i64} {
  func.func @critic_kernel(%arg0: i32, %arg1: memref<2x16xf32, #tpu.memory_space<vmem>>, %arg2: memref<2x4xf32, #tpu.memory_space<vmem>>, %arg3: memref<16x400xbf16, #tpu.memory_space<vmem>>, %arg4: memref<1x400xf32, #tpu.memory_space<vmem>>, %arg5: memref<1x400xf32, #tpu.memory_space<vmem>>, %arg6: memref<1x400xf32, #tpu.memory_space<vmem>>, %arg7: memref<400x300xbf16, #tpu.memory_space<vmem>>, %arg8: memref<1x300xf32, #tpu.memory_space<vmem>>, %arg9: memref<1x300xf32, #tpu.memory_space<vmem>>, %arg10: memref<1x300xf32, #tpu.memory_space<vmem>>, %arg11: memref<4x300xbf16, #tpu.memory_space<vmem>>, %arg12: memref<1x300xf32, #tpu.memory_space<vmem>>, %arg13: memref<1x300xf32, #tpu.memory_space<vmem>>, %arg14: memref<1x1xf32, #tpu.memory_space<vmem>>, %arg15: memref<2x1xf32, #tpu.memory_space<vmem>>) attributes {dimension_semantics = [#tpu.dimension_semantics<parallel>], iteration_bounds = array<i64: 1>, scalar_prefetch = 0 : i64, scratch_operands = 0 : i64, tpu.core_type = #tpu.core_type<tc>, window_params = [{transform_indices = @transform_0, window_bounds = array<i64: 2, 16>}, {transform_indices = @transform_1, window_bounds = array<i64: 2, 4>}, {pipeline_mode = #tpu.pipeline_mode<synchronous>, transform_indices = @transform_2, window_bounds = array<i64: 16, 400>}, {pipeline_mode = #tpu.pipeline_mode<synchronous>, transform_indices = @transform_3, window_bounds = array<i64: 1, 400>}, {pipeline_mode = #tpu.pipeline_mode<synchronous>, transform_indices = @transform_4, window_bounds = array<i64: 1, 400>}, {pipeline_mode = #tpu.pipeline_mode<synchronous>, transform_indices = @transform_5, window_bounds = array<i64: 1, 400>}, {pipeline_mode = #tpu.pipeline_mode<synchronous>, transform_indices = @transform_6, window_bounds = array<i64: 400, 300>}, {pipeline_mode = #tpu.pipeline_mode<synchronous>, transform_indices = @transform_7, window_bounds = array<i64: 1, 300>}, {pipeline_mode = #tpu.pipeline_mode<synchronous>, transform_indices = @transform_8, window_bounds = array<i64: 1, 300>}, {pipeline_mode = #tpu.pipeline_mode<synchronous>, transform_indices = @transform_9, window_bounds = array<i64: 1, 300>}, {pipeline_mode = #tpu.pipeline_mode<synchronous>, transform_indices = @transform_10, window_bounds = array<i64: 4, 300>}, {pipeline_mode = #tpu.pipeline_mode<synchronous>, transform_indices = @transform_11, window_bounds = array<i64: 1, 300>}, {pipeline_mode = #tpu.pipeline_mode<synchronous>, transform_indices = @transform_12, window_bounds = array<i64: 1, 300>}, {pipeline_mode = #tpu.pipeline_mode<synchronous>, transform_indices = @transform_13, window_bounds = array<i64: 1, 1>}, {transform_indices = @transform_14, window_bounds = array<i64: 2, 1>}]} {
    %c0 = arith.constant 0 : index
    %c0_0 = arith.constant 0 : index
    %0 = vector.load %arg1[%c0, %c0_0] : memref<2x16xf32, #tpu.memory_space<vmem>>, vector<2x16xf32>
    %1 = arith.truncf %0 : vector<2x16xf32> to vector<2x16xbf16>
    %c0_1 = arith.constant 0 : index
    %c0_2 = arith.constant 0 : index
    %2 = vector.load %arg2[%c0_1, %c0_2] : memref<2x4xf32, #tpu.memory_space<vmem>>, vector<2x4xf32>
    %3 = arith.truncf %2 : vector<2x4xf32> to vector<2x4xbf16>
    %c0_3 = arith.constant 0 : index
    %c0_4 = arith.constant 0 : index
    %4 = vector.load %arg3[%c0_3, %c0_4] : memref<16x400xbf16, #tpu.memory_space<vmem>>, vector<16x400xbf16>
    %cst = arith.constant dense<0.000000e+00> : vector<2x400xf32>
    %5 = tpu.matmul %1, %4, %cst {dimension_numbers = #tpu.dot_dimension_numbers<[1], [0], [0], [1], [0, 0, 1, 1], [], []>} : vector<2x16xbf16>, vector<16x400xbf16>, vector<2x400xf32> -> vector<2x400xf32>
    %c0_5 = arith.constant 0 : index
    %c0_6 = arith.constant 0 : index
    %6 = vector.load %arg4[%c0_5, %c0_6] : memref<1x400xf32, #tpu.memory_space<vmem>>, vector<1x400xf32>
    %7 = vector.broadcast %6 : vector<1x400xf32> to vector<2x400xf32>
    %8 = arith.addf %5, %7 : vector<2x400xf32>
    %c0_7 = arith.constant 0 : index
    %c0_8 = arith.constant 0 : index
    %9 = vector.load %arg5[%c0_7, %c0_8] : memref<1x400xf32, #tpu.memory_space<vmem>>, vector<1x400xf32>
    %c0_9 = arith.constant 0 : index
    %c0_10 = arith.constant 0 : index
    %10 = vector.load %arg6[%c0_9, %c0_10] : memref<1x400xf32, #tpu.memory_space<vmem>>, vector<1x400xf32>
    %cst_11 = arith.constant dense<0.000000e+00> : vector<2xf32>
    %11 = vector.multi_reduction <add>, %8, %cst_11 [1] : vector<2x400xf32> to vector<2xf32>
    %12 = vector.shape_cast %11 : vector<2xf32> to vector<2x1xf32>
    %cst_12 = arith.constant 4.000000e+02 : f32
    %13 = vector.broadcast %cst_12 : f32 to vector<2x1xf32>
    %14 = arith.divf %12, %13 : vector<2x1xf32>
    %15 = arith.mulf %8, %8 : vector<2x400xf32>
    %cst_13 = arith.constant dense<0.000000e+00> : vector<2xf32>
    %16 = vector.multi_reduction <add>, %15, %cst_13 [1] : vector<2x400xf32> to vector<2xf32>
    %17 = vector.shape_cast %16 : vector<2xf32> to vector<2x1xf32>
    %cst_14 = arith.constant 4.000000e+02 : f32
    %18 = vector.broadcast %cst_14 : f32 to vector<2x1xf32>
    %19 = arith.divf %17, %18 : vector<2x1xf32>
    %20 = arith.mulf %14, %14 : vector<2x1xf32>
    %21 = arith.subf %19, %20 : vector<2x1xf32>
    %cst_15 = arith.constant 0.000000e+00 : f32
    %22 = vector.broadcast %cst_15 : f32 to vector<2x1xf32>
    %23 = arith.maximumf %21, %22 : vector<2x1xf32>
    %24 = vector.broadcast %14 : vector<2x1xf32> to vector<2x400xf32>
    %25 = arith.subf %8, %24 : vector<2x400xf32>
    %cst_16 = arith.constant 9.99999974E-6 : f32
    %26 = vector.broadcast %cst_16 : f32 to vector<2x1xf32>
    %27 = arith.addf %23, %26 : vector<2x1xf32>
    %28 = math.rsqrt %27 : vector<2x1xf32>
    %29 = vector.broadcast %28 : vector<2x1xf32> to vector<2x400xf32>
    %30 = arith.mulf %25, %29 : vector<2x400xf32>
    %31 = vector.broadcast %9 : vector<1x400xf32> to vector<2x400xf32>
    %32 = arith.mulf %30, %31 : vector<2x400xf32>
    %33 = vector.broadcast %10 : vector<1x400xf32> to vector<2x400xf32>
    %34 = arith.addf %32, %33 : vector<2x400xf32>
    %cst_17 = arith.constant 0.000000e+00 : f32
    %35 = vector.broadcast %cst_17 : f32 to vector<2x400xf32>
    %36 = arith.maximumf %34, %35 : vector<2x400xf32>
    %37 = arith.truncf %36 : vector<2x400xf32> to vector<2x400xbf16>
    %c0_18 = arith.constant 0 : index
    %c0_19 = arith.constant 0 : index
    %38 = vector.load %arg7[%c0_18, %c0_19] : memref<400x300xbf16, #tpu.memory_space<vmem>>, vector<400x300xbf16>
    %cst_20 = arith.constant dense<0.000000e+00> : vector<2x300xf32>
    %39 = tpu.matmul %37, %38, %cst_20 {dimension_numbers = #tpu.dot_dimension_numbers<[1], [0], [0], [1], [0, 0, 1, 1], [], []>} : vector<2x400xbf16>, vector<400x300xbf16>, vector<2x300xf32> -> vector<2x300xf32>
    %c0_21 = arith.constant 0 : index
    %c0_22 = arith.constant 0 : index
    %40 = vector.load %arg8[%c0_21, %c0_22] : memref<1x300xf32, #tpu.memory_space<vmem>>, vector<1x300xf32>
    %41 = vector.broadcast %40 : vector<1x300xf32> to vector<2x300xf32>
    %42 = arith.addf %39, %41 : vector<2x300xf32>
    %c0_23 = arith.constant 0 : index
    %c0_24 = arith.constant 0 : index
    %43 = vector.load %arg9[%c0_23, %c0_24] : memref<1x300xf32, #tpu.memory_space<vmem>>, vector<1x300xf32>
    %c0_25 = arith.constant 0 : index
    %c0_26 = arith.constant 0 : index
    %44 = vector.load %arg10[%c0_25, %c0_26] : memref<1x300xf32, #tpu.memory_space<vmem>>, vector<1x300xf32>
    %cst_27 = arith.constant dense<0.000000e+00> : vector<2xf32>
    %45 = vector.multi_reduction <add>, %42, %cst_27 [1] : vector<2x300xf32> to vector<2xf32>
    %46 = vector.shape_cast %45 : vector<2xf32> to vector<2x1xf32>
    %cst_28 = arith.constant 3.000000e+02 : f32
    %47 = vector.broadcast %cst_28 : f32 to vector<2x1xf32>
    %48 = arith.divf %46, %47 : vector<2x1xf32>
    %49 = arith.mulf %42, %42 : vector<2x300xf32>
    %cst_29 = arith.constant dense<0.000000e+00> : vector<2xf32>
    %50 = vector.multi_reduction <add>, %49, %cst_29 [1] : vector<2x300xf32> to vector<2xf32>
    %51 = vector.shape_cast %50 : vector<2xf32> to vector<2x1xf32>
    %cst_30 = arith.constant 3.000000e+02 : f32
    %52 = vector.broadcast %cst_30 : f32 to vector<2x1xf32>
    %53 = arith.divf %51, %52 : vector<2x1xf32>
    %54 = arith.mulf %48, %48 : vector<2x1xf32>
    %55 = arith.subf %53, %54 : vector<2x1xf32>
    %cst_31 = arith.constant 0.000000e+00 : f32
    %56 = vector.broadcast %cst_31 : f32 to vector<2x1xf32>
    %57 = arith.maximumf %55, %56 : vector<2x1xf32>
    %58 = vector.broadcast %48 : vector<2x1xf32> to vector<2x300xf32>
    %59 = arith.subf %42, %58 : vector<2x300xf32>
    %cst_32 = arith.constant 9.99999974E-6 : f32
    %60 = vector.broadcast %cst_32 : f32 to vector<2x1xf32>
    %61 = arith.addf %57, %60 : vector<2x1xf32>
    %62 = math.rsqrt %61 : vector<2x1xf32>
    %63 = vector.broadcast %62 : vector<2x1xf32> to vector<2x300xf32>
    %64 = arith.mulf %59, %63 : vector<2x300xf32>
    %65 = vector.broadcast %43 : vector<1x300xf32> to vector<2x300xf32>
    %66 = arith.mulf %64, %65 : vector<2x300xf32>
    %67 = vector.broadcast %44 : vector<1x300xf32> to vector<2x300xf32>
    %68 = arith.addf %66, %67 : vector<2x300xf32>
    %c0_33 = arith.constant 0 : index
    %c0_34 = arith.constant 0 : index
    %69 = vector.load %arg11[%c0_33, %c0_34] : memref<4x300xbf16, #tpu.memory_space<vmem>>, vector<4x300xbf16>
    %cst_35 = arith.constant dense<0.000000e+00> : vector<2x300xf32>
    %70 = tpu.matmul %3, %69, %cst_35 {dimension_numbers = #tpu.dot_dimension_numbers<[1], [0], [0], [1], [0, 0, 1, 1], [], []>} : vector<2x4xbf16>, vector<4x300xbf16>, vector<2x300xf32> -> vector<2x300xf32>
    %c0_36 = arith.constant 0 : index
    %c0_37 = arith.constant 0 : index
    %71 = vector.load %arg12[%c0_36, %c0_37] : memref<1x300xf32, #tpu.memory_space<vmem>>, vector<1x300xf32>
    %72 = vector.broadcast %71 : vector<1x300xf32> to vector<2x300xf32>
    %73 = arith.addf %70, %72 : vector<2x300xf32>
    %74 = arith.addf %68, %73 : vector<2x300xf32>
    %cst_38 = arith.constant 0.000000e+00 : f32
    %75 = vector.broadcast %cst_38 : f32 to vector<2x300xf32>
    %76 = arith.maximumf %74, %75 : vector<2x300xf32>
    %c0_39 = arith.constant 0 : index
    %c0_40 = arith.constant 0 : index
    %77 = vector.load %arg13[%c0_39, %c0_40] : memref<1x300xf32, #tpu.memory_space<vmem>>, vector<1x300xf32>
    %78 = vector.broadcast %77 : vector<1x300xf32> to vector<2x300xf32>
    %79 = arith.mulf %76, %78 : vector<2x300xf32>
    %cst_41 = arith.constant dense<0.000000e+00> : vector<2xf32>
    %80 = vector.multi_reduction <add>, %79, %cst_41 [1] : vector<2x300xf32> to vector<2xf32>
    %81 = vector.shape_cast %80 : vector<2xf32> to vector<2x1xf32>
    %c0_42 = arith.constant 0 : index
    %c0_43 = arith.constant 0 : index
    %82 = vector.load %arg14[%c0_42, %c0_43] : memref<1x1xf32, #tpu.memory_space<vmem>>, vector<1x1xf32>
    %83 = vector.broadcast %82 : vector<1x1xf32> to vector<2x1xf32>
    %84 = arith.addf %81, %83 : vector<2x1xf32>
    %c0_44 = arith.constant 0 : index
    %c0_45 = arith.constant 0 : index
    %85 = vector.load %arg15[%c0_44, %c0_45] : memref<2x1xf32, #tpu.memory_space<vmem>>, vector<2x1xf32>
    tpu.vector_store %arg15[%c0_44, %c0_45], %84 {strides = array<i32>} : memref<2x1xf32, #tpu.memory_space<vmem>>, vector<2x1xf32>,
    return
  }
  func.func @transform_0(%arg0: i32) -> (i32, i32) {
    %c0_i32 = arith.constant 0 : i32
    %c0_i32_0 = arith.constant 0 : i32
    return %arg0, %c0_i32 : i32, i32
  }
  func.func @transform_1(%arg0: i32) -> (i32, i32) {
    %c0_i32 = arith.constant 0 : i32
    %c0_i32_0 = arith.constant 0 : i32
    return %arg0, %c0_i32 : i32, i32
  }
  func.func @transform_2(%arg0: i32) -> (i32, i32) {
    %c0_i32 = arith.constant 0 : i32
    %c0_i32_0 = arith.constant 0 : i32
    %c0_i32_1 = arith.constant 0 : i32
    return %c0_i32, %c0_i32_0 : i32, i32
  }
  func.func @transform_3(%arg0: i32) -> (i32, i32) {
    %c0_i32 = arith.constant 0 : i32
    %c0_i32_0 = arith.constant 0 : i32
    %c0_i32_1 = arith.constant 0 : i32
    return %c0_i32, %c0_i32_0 : i32, i32
  }
  func.func @transform_4(%arg0: i32) -> (i32, i32) {
    %c0_i32 = arith.constant 0 : i32
    %c0_i32_0 = arith.constant 0 : i32
    %c0_i32_1 = arith.constant 0 : i32
    return %c0_i32, %c0_i32_0 : i32, i32
  }
  func.func @transform_5(%arg0: i32) -> (i32, i32) {
    %c0_i32 = arith.constant 0 : i32
    %c0_i32_0 = arith.constant 0 : i32
    %c0_i32_1 = arith.constant 0 : i32
    return %c0_i32, %c0_i32_0 : i32, i32
  }
  func.func @transform_6(%arg0: i32) -> (i32, i32) {
    %c0_i32 = arith.constant 0 : i32
    %c0_i32_0 = arith.constant 0 : i32
    %c0_i32_1 = arith.constant 0 : i32
    return %c0_i32, %c0_i32_0 : i32, i32
  }
  func.func @transform_7(%arg0: i32) -> (i32, i32) {
    %c0_i32 = arith.constant 0 : i32
    %c0_i32_0 = arith.constant 0 : i32
    %c0_i32_1 = arith.constant 0 : i32
    return %c0_i32, %c0_i32_0 : i32, i32
  }
  func.func @transform_8(%arg0: i32) -> (i32, i32) {
    %c0_i32 = arith.constant 0 : i32
    %c0_i32_0 = arith.constant 0 : i32
    %c0_i32_1 = arith.constant 0 : i32
    return %c0_i32, %c0_i32_0 : i32, i32
  }
  func.func @transform_9(%arg0: i32) -> (i32, i32) {
    %c0_i32 = arith.constant 0 : i32
    %c0_i32_0 = arith.constant 0 : i32
    %c0_i32_1 = arith.constant 0 : i32
    return %c0_i32, %c0_i32_0 : i32, i32
  }
  func.func @transform_10(%arg0: i32) -> (i32, i32) {
    %c0_i32 = arith.constant 0 : i32
    %c0_i32_0 = arith.constant 0 : i32
    %c0_i32_1 = arith.constant 0 : i32
    return %c0_i32, %c0_i32_0 : i32, i32
  }
  func.func @transform_11(%arg0: i32) -> (i32, i32) {
    %c0_i32 = arith.constant 0 : i32
    %c0_i32_0 = arith.constant 0 : i32
    %c0_i32_1 = arith.constant 0 : i32
    return %c0_i32, %c0_i32_0 : i32, i32
  }
  func.func @transform_12(%arg0: i32) -> (i32, i32) {
    %c0_i32 = arith.constant 0 : i32
    %c0_i32_0 = arith.constant 0 : i32
    %c0_i32_1 = arith.constant 0 : i32
    return %c0_i32, %c0_i32_0 : i32, i32
  }
  func.func @transform_13(%arg0: i32) -> (i32, i32) {
    %c0_i32 = arith.constant 0 : i32
    %c0_i32_0 = arith.constant 0 : i32
    %c0_i32_1 = arith.constant 0 : i32
    return %c0_i32, %c0_i32_0 : i32, i32
  }
  func.func @transform_14(%arg0: i32) -> (i32, i32) {
    %c0_i32 = arith.constant 0 : i32
    %c0_i32_0 = arith.constant 0 : i32
    return %arg0, %c0_i32 : i32, i32
  }
}

</mosaic_0001>

<bundles_post_ra>
// kernel: tpu_custom_call.1
= control target key start
LH: loop header
LB: loop body
LE: loop exit
PB: predicated region body
PF: predicated region fallthrough
CT: control target
= control target key end

     0   :  { %s1941_s0 = inlined_call_operand.hbm [shape: f32[2,16], index: 0, kind: input, shape index: {}]   ;;  %s1942_s1 = inlined_call_operand.hbm [shape: f32[2,4], index: 1, kind: input, shape index: {}]   ;;  %s1943_s2 = inlined_call_operand.hbm [shape: bf16[16,400], index: 2, kind: input, shape index: {}]   ;;  %s1944_s3 = inlined_call_operand.vmem [shape: f32[1,400], index: 3, kind: input, shape index: {}]   ;;  %s1945_s4 = inlined_call_operand.hbm [shape: f32[1,400], index: 4, kind: input, shape index: {}]   ;;  %s1946_s5 = inlined_call_operand.hbm [shape: f32[1,400], index: 5, kind: input, shape index: {}]   ;;  %s1947_s6 = inlined_call_operand.hbm [shape: bf16[400,300], index: 6, kind: input, shape index: {}]   ;;  %s1948_s7 = inlined_call_operand.vmem [shape: f32[1,300], index: 7, kind: input, shape index: {}]   ;;  %s1949_s8 = inlined_call_operand.vmem [shape: f32[1,300], index: 8, kind: input, shape index: {}]   ;;  %s1950_s9 = inlined_call_operand.hbm [shape: f32[1,300], index: 9, kind: input, shape index: {}]   ;;  %s1951_s10 = inlined_call_operand.vmem [shape: bf16[4,300], index: 10, kind: input, shape index: {}]   ;;  %s1952_s11 = inlined_call_operand.vmem [shape: f32[1,300], index: 11, kind: input, shape index: {}]   ;;  %s1953_s12 = inlined_call_operand.vmem [shape: f32[1,300], index: 12, kind: input, shape index: {}]   ;;  %s1954_s13 = inlined_call_operand.<no memory space> [shape: f32[1,1], index: 13, kind: input, shape index: {}]   ;;  %s1955_s14 = inlined_call_operand.vmem [shape: f32[2,1], index: 14, kind: output, shape index: {}]  }
   0x1   :  { %v19_v0 = vstv %s1954_s13 }
   0x2   :  { %20 = vst [vmem:[#allocation2] sm:$0x1] %v19_v0 }
   0x3   :  { %21 = vsyncpa [#allocation4], 0 }
   0x4   :  { %22 = vsyncpa [#allocation6], 0 }
   0x5   :  { %23 = vsyncpa [#allocation9], 0 }
   0x6   :  { %24 = vsyncpa [#allocation12], 0  ;;  %s1696_s15 = smov [#allocation5]   ;;  %s1697_s17 = smov [#allocation8]  }
   0x7   :  { %s41_s16 = sshll.u32 %s1696_s15, 4  ;;  %s65_s18 = sshll.u32 %s1697_s17, 4  ;;  %s42_s16 = int_to_ptr.vmem [resolvable:$true] %s41_s16  ;;  %s66_s18 = int_to_ptr.vmem [resolvable:$true] %s65_s18 }
   0x8   :  { %s1556_s19 = scalar_lea.vmem %s42_s16, 32  ;;  %p1561_p1 = scmp.lt.s32.totalorder %s42_s16, %s42_s16 }
   0x9   :  { %p1557_p0 = scmp.ne.s32.totalorder %s42_s16, %s1556_s19  ;;  %p1562_p2 = scmp.lt.s32.totalorder %s1556_s19, %s1556_s19 }
   0xb   :  { %p1563_p3 = por %p1562_p2, %p1561_p1 }
   0xd   :  { %p1564_p4 = pnand %p1563_p3, %p1557_p0 }
   0xf   :  { %1567 = shalt.err (!%p1564_p4)
}
  0x10   :  { %44 = dma.hbm_to_vmem [thread:$0]  %s1942_s1, 32, %s42_s16, [#allocation6]  }
  0x11   :  { %s1576_s21 = scalar_lea.vmem %s66_s18, 64  ;;  %p1581_p6 = scmp.lt.s32.totalorder %s66_s18, %s66_s18 }
  0x12   :  { %p1577_p5 = scmp.ne.s32.totalorder %s66_s18, %s1576_s21  ;;  %p1582_p7 = scmp.lt.s32.totalorder %s1576_s21, %s1576_s21 }
  0x14   :  { %p1583_p8 = por %p1582_p7, %p1581_p6 }
  0x16   :  { %p1584_p9 = pnand %p1583_p8, %p1577_p5 }
  0x18   :  { %1587 = shalt.err (!%p1584_p9)
}
  0x19   :  { %68 = dma.hbm_to_vmem [thread:$0]  %s1945_s4, 64, %s66_s18, [#allocation9]  }
  0x1a   :  { %s1698_s24 = smov [#allocation11]  }
  0x1b   :  { %s84_s25 = sshll.u32 %s1698_s24, 4  ;;  %s85_s25 = int_to_ptr.vmem [resolvable:$true] %s84_s25 }
  0x1c   :  { %s1596_s26 = scalar_lea.vmem %s85_s25, 9600  ;;  %p1601_p11 = scmp.lt.s32.totalorder %s85_s25, %s85_s25 }
  0x1d   :  { %p1597_p10 = scmp.ne.s32.totalorder %s85_s25, %s1596_s26  ;;  %p1602_p12 = scmp.lt.s32.totalorder %s1596_s26, %s1596_s26 }
  0x1f   :  { %p1603_p13 = por %p1602_p12, %p1601_p11 }
  0x21   :  { %p1604_p0 = pnand %p1603_p13, %p1597_p10 }
  0x23   :  { %1607 = shalt.err (!%p1604_p0)
}
  0x24   :  { %s1699_s1 = smov 192   ;;  %s1700_s27 = smov 12  }
  0x25   :  { %90 = dma.hbm_to_vmem [thread:$0]  %s1947_s6, 9600, %s85_s25, [#allocation12], %s1699_s1, %s1699_s1, %s1700_s27  }
  0x26   :  { %s1701_s30 = smov [#allocation3]   ;;  %s1702_s4 = smov [#allocation7]  }
  0x27   :  { %s31_s15 = sshll.u32 %s1701_s30, 4  ;;  %s50_s16 = sshll.u32 %s1702_s4, 4  ;;  %s32_s15 = int_to_ptr.vmem [resolvable:$true] %s31_s15  ;;  %s51_s16 = int_to_ptr.vmem [resolvable:$true] %s50_s16 }
  0x28   :  { %s1616_s17 = scalar_lea.vmem %s32_s15, 32  ;;  %p1621_p2 = scmp.lt.s32.totalorder %s32_s15, %s32_s15 }
  0x29   :  { %p1617_p1 = scmp.ne.s32.totalorder %s32_s15, %s1616_s17  ;;  %p1622_p3 = scmp.lt.s32.totalorder %s1616_s17, %s1616_s17 }
  0x2b   :  { %p1623_p4 = por %p1622_p3, %p1621_p2 }
  0x2d   :  { %p1624_p5 = pnand %p1623_p4, %p1617_p1 }
  0x2f   :  { %1627 = shalt.err (!%p1624_p5)
}
  0x30   :  { %34 = dma.hbm_to_vmem [thread:$0]  %s1941_s0, 32, %s32_s15, [#allocation4]  }
  0x31   :  { %s1636_s20 = scalar_lea.vmem %s51_s16, 512  ;;  %p1641_p7 = scmp.lt.s32.totalorder %s51_s16, %s51_s16 }
  0x32   :  { %p1637_p6 = scmp.ne.s32.totalorder %s51_s16, %s1636_s20  ;;  %p1642_p8 = scmp.lt.s32.totalorder %s1636_s20, %s1636_s20 }
  0x34   :  { %p1643_p9 = por %p1642_p8, %p1641_p7 }
  0x36   :  { %p1644_p10 = pnand %p1643_p9, %p1637_p6 }
  0x38   :  { %1647 = shalt.err (!%p1644_p10)
}
  0x39   :  { %s1703_s6 = smov 256   ;;  %s1704_s13 = smov 16  }
  0x3a   :  { %56 = dma.hbm_to_vmem [thread:$0]  %s1943_s2, 512, %s51_s16, [#allocation6], %s1703_s6, %s1703_s6, %s1704_s13  }
  0x3b   :  { %s1705_s23 = smov [#allocation10]   ;;  %s1706_s25 = smov [#allocation13]  }
  0x3c   :  { %s75_s24 = sshll.u32 %s1705_s23, 4  ;;  %s101_s26 = sshll.u32 %s1706_s25, 4  ;;  %s76_s24 = int_to_ptr.vmem [resolvable:$true] %s75_s24  ;;  %s102_s26 = int_to_ptr.vmem [resolvable:$true] %s101_s26 }
  0x3d   :  { %s1656_s0 = scalar_lea.vmem %s76_s24, 64  ;;  %p1661_p12 = scmp.lt.s32.totalorder %s76_s24, %s76_s24 }
  0x3e   :  { %p1657_p11 = scmp.ne.s32.totalorder %s76_s24, %s1656_s0  ;;  %p1662_p13 = scmp.lt.s32.totalorder %s1656_s0, %s1656_s0 }
  0x40   :  { %p1663_p0 = por %p1662_p13, %p1661_p12 }
  0x42   :  { %p1664_p1 = pnand %p1663_p0, %p1657_p11 }
  0x44   :  { %1667 = shalt.err (!%p1664_p1)
}
  0x45   :  { %78 = dma.hbm_to_vmem [thread:$0]  %s1946_s5, 64, %s76_s24, [#allocation9]  }
  0x46   :  { %s1676_s28 = scalar_lea.vmem %s102_s26, 48  ;;  %s1680_s2 = scalar_lea.vmem %s102_s26, 64 }
  0x47   :  { %p1677_p2 = scmp.ne.s32.totalorder %s102_s26, %s1676_s28  ;;  %p1681_p3 = scmp.lt.s32.totalorder %s102_s26, %s102_s26 }
  0x48   :  { %p1682_p4 = scmp.lt.s32.totalorder %s1680_s2, %s1676_s28 }
  0x4a   :  { %p1683_p5 = por %p1682_p4, %p1681_p3 }
  0x4c   :  { %p1684_p6 = pnand %p1683_p5, %p1677_p2 }
  0x4e   :  { %1687 = shalt.err (!%p1684_p6)
}
  0x4f   :  { %104 = dma.hbm_to_vmem [thread:$0]  %s1950_s9, 48, %s102_s26, [#allocation12]  }
  0x50   :  { %1688 = dma.done.wait [#allocation4], 32  }
  0x51   :  { %1689 = vsyncadd [#allocation4], 4294967264 }
  0x52   :  { %1690 = dma.done.wait [#allocation6], 544  }
  0x53   :  { %1691 = vsyncadd [#allocation6], 4294966752 }
  0x54   :  { %1692 = dma.done.wait [#allocation9], 128  }
  0x55   :  { %1693 = vsyncadd [#allocation9], 4294967168 }
  0x56   :  { %1694 = dma.done.wait [#allocation12], 9648  }
  0x57   :  { %1695 = vsyncadd [#allocation12], 4294957648  ;;  %v1707_v1 = vmov 0   ;;  %v1437_v2 = vld [vmem:[#allocation7 + $0x4] ss:$16 sps:$4 sm:$0xff]   ;;  %vm185_vm0 = vcmask 130048   ;;  %v145_v22 = vlaneseq }
  0x58   :  { %221 = vmatprep.mubr.bf16.mxu1 %v1707_v1  ;;  %v1439_v3 = vld [vmem:[#allocation7] ss:$16 sps:$4 sm:$0xff]   ;;  %v135_v4 = vld [vmem:[#allocation3] sm:$0x3]  ;;  %203 = vmatprep.subr.bf16.mxu1 %v1437_v2  ;;  %v1440_v7 = vld [vmem:[#allocation7 + $0x8] ss:$16 sps:$4 sm:$0xff]  }
  0x59   :  { %v136_v5 = vpack.c.bf16 %v135_v4, %v135_v4  ;;  %v1442_v6 = vld [vmem:[#allocation7 + $0xc] ss:$16 sps:$4 sm:$0xff]   ;;  %204 = vmatpush1.bf16.msra.mxu1 %v1439_v3  ;;  %v1443_v8 = vld [vmem:[#allocation11 + $0xac] ss:$12 sps:$4 sm:$0xff]   ;;  %v1448_v11 = vld [vmem:[#allocation11 + $0x90] ss:$12 sps:$4 sm:$0xff]  }
  0x5a   :  { %244 = vmatprep.subr.bf16.mxu1 %v1442_v6  ;;  %v1445_v9 = vld [vmem:[#allocation11 + $0xa8] ss:$12 sps:$4 sm:$0xff]   ;;  %891 = vmatprep.subr.bf16.mxu0 %v1443_v8  ;;  %v1451_v13 = vld [vmem:[#allocation11 + $0x78] ss:$12 sps:$4 sm:$0xff]   ;;  %v1454_v15 = vld [vmem:[#allocation11 + $0x60] ss:$12 sps:$4 sm:$0xff]  }
  0x5b   :  { %v1446_v10 = vld [vmem:[#allocation11 + $0x94] ss:$12 sps:$4 sm:$0xff]   ;;  %892 = vmatpush1.bf16.msra.mxu0 %v1445_v9  ;;  %v1449_v12 = vld [vmem:[#allocation11 + $0x7c] ss:$12 sps:$4 sm:$0xff]   ;;  %v1452_v14 = vld [vmem:[#allocation11 + $0x64] ss:$12 sps:$4 sm:$0xff]  }
  0x5c   :  { %1309 = vmatmul.mubr.msk.bf16.vlgmr.msra.gmra.mxu1 %vm185_vm0, %v136_v5  ;;  %893 = vmatprep.subr.bf16.mxu0 %v1446_v10  ;;  %v1455_v16 = vld [vmem:[#allocation11 + $0x4c] ss:$12 sps:$4 sm:$0xff]   ;;  %v1457_v17 = vld [vmem:[#allocation11 + $0x48] ss:$12 sps:$4 sm:$0xff]   ;;  %v1460_v19 = vld [vmem:[#allocation11 + $0x30] ss:$12 sps:$4 sm:$0xff]  }
  0x5d   :  { %245 = vmatpush1.bf16.msra.mxu1 %v1440_v7  ;;  %262 = vmatprep.mubr.bf16.mxu1 %v1707_v1  ;;  %v1458_v18 = vld [vmem:[#allocation11 + $0x34] ss:$12 sps:$4 sm:$0xff]   ;;  %v1461_v20 = vld [vmem:[#allocation11 + $0x1c] ss:$12 sps:$4 sm:$0xff]   ;;  %v1463_v21 = vld [vmem:[#allocation11 + $0x18] ss:$12 sps:$4 sm:$0xff]  }
  0x5e   :  { %v1814_v23 = vshrl.u32 %v145_v22, 7  ;;  %v143_v26 = vld [vmem:[%s1944_s3] sm:$0xf]  ;;  %vm273_vm1 = vcmask 1041408   ;;  %vm279_vm2 = vcmask 123904   ;;  %vm1160_vm3 = vcmask 31744  }
  0x5f   :  { %894 = vmatpush1.bf16.msra.mxu0 %v1448_v11  ;;  %v1464_v63 = vld [vmem:[#allocation11 + $0x4] ss:$12 sps:$4 sm:$0xff]   ;;  %v1468_v0 = vld [vmem:[#allocation11 + $0x22c] ss:$12 sps:$4 sm:$0xff]   ;;  %v1466_v2 = vld [vmem:[#allocation11 + $0x228] ss:$12 sps:$4 sm:$0xff]  }
  0x60   :  { %895 = vmatprep.subr.bf16.mxu0 %v1449_v12  ;;  %v1817_v24 = vsub.s32 0, %v1814_v23  ;;  %v1820_v25 = vsub.s32 1, %v1814_v23  ;;  %v1828_v30 = vsub.s32 2, %v1814_v23  ;;  %v1835_v34 = vsub.s32 3, %v1814_v23  ;;  %v1469_v3 = vld [vmem:[#allocation11] ss:$12 sps:$4 sm:$0xff]   ;;  %932 = vmatprep.subr.bf16.mxu1 %v1468_v0 }
  0x61   :  { %v1470_v4 = vld [vmem:[#allocation11 + $0x16c] ss:$12 sps:$4 sm:$0xff]   ;;  %v1472_v6 = vld [vmem:[#allocation11 + $0x210] ss:$12 sps:$4 sm:$0xff]   ;;  %v1475_v7 = vld [vmem:[#allocation11 + $0x168] ss:$12 sps:$4 sm:$0xff]  }
  0x62   :  { %v148_v27 = vrot.slane %v143_v26, %v1817_v24  ;;  %v152_v28 = vrot.slane %v143_v26, %v1820_v25  ;;  %v156_v37 = vrot.slane %v143_v26, %v1828_v30  ;;  %v160_v40 = vrot.slane %v143_v26, %v1835_v34  ;;  %v1476_v8 = vld [vmem:[#allocation11 + $0x154] ss:$12 sps:$4 sm:$0xff]   ;;  %v1480_v9 = vld [vmem:[#allocation11 + $0x1fc] ss:$12 sps:$4 sm:$0xff]   ;;  %v1478_v10 = vld [vmem:[#allocation11 + $0x1f8] ss:$12 sps:$4 sm:$0xff]  }
  0x63   :  { %896 = vmatpush1.bf16.msra.mxu0 %v1451_v13  ;;  %v1481_v11 = vld [vmem:[#allocation11 + $0x150] ss:$12 sps:$4 sm:$0xff]   ;;  %v1499_v26 = vld [vmem:[#allocation11 + $0x108] ss:$12 sps:$4 sm:$0xff]   ;;  %vm1710_vm4 = vmmov 0   ;;  %vm1058_vm5 = vcmask 353280  }
  0x64   :  { %1310 = vmatmul.mubr.msk.bf16.vlgmr.msra.gmra.mxu1 %vm185_vm0, %v136_v5  ;;  %897 = vmatprep.subr.bf16.mxu0 %v1452_v14  ;;  %v1474_v5 = vld [vmem:[#allocation11 + $0x214] ss:$12 sps:$4 sm:$0xff]   ;;  %v1482_v12 = vld [vmem:[#allocation11 + $0x13c] ss:$12 sps:$4 sm:$0xff]   ;;  %v1486_v13 = vld [vmem:[#allocation11 + $0x1e4] ss:$12 sps:$4 sm:$0xff]  }
  0x65   :  { %933 = vmatpush1.bf16.msra.mxu1 %v1466_v2  ;;  %v1484_v14 = vld [vmem:[#allocation11 + $0x1e0] ss:$12 sps:$4 sm:$0xff]   ;;  %v1496_v22 = vld [vmem:[#allocation11 + $0x1b0] ss:$12 sps:$4 sm:$0xff]   ;;  %vm1295_vm6 = vcmask 1024  }
  0x66   :  { %934 = vmatprep.subr.bf16.mxu1 %v1474_v5 }
  0x67   :  { %898 = vmatpush1.bf16.msra.mxu0 %v1454_v15  ;;  %v1487_v15 = vld [vmem:[#allocation11 + $0x138] ss:$12 sps:$4 sm:$0xff]  }
  0x68   :  { %899 = vmatprep.subr.bf16.mxu0 %v1455_v16  ;;  %v1488_v16 = vld [vmem:[#allocation11 + $0x124] ss:$12 sps:$4 sm:$0xff]  }
  0x69   :  { %935 = vmatpush1.bf16.msra.mxu1 %v1472_v6 }
  0x6a   :  { %936 = vmatprep.subr.bf16.mxu1 %v1480_v9 }
  0x6b   :  { %900 = vmatpush1.bf16.msra.mxu0 %v1457_v17  ;;  %v1492_v17 = vld [vmem:[#allocation11 + $0x1cc] ss:$12 sps:$4 sm:$0xff]  }
  0x6c   :  { %901 = vmatprep.subr.bf16.mxu0 %v1458_v18  ;;  %v1490_v18 = vld [vmem:[#allocation11 + $0x1c8] ss:$12 sps:$4 sm:$0xff]  }
  0x6d   :  { %937 = vmatpush1.bf16.msra.mxu1 %v1478_v10 }
  0x6e   :  { %938 = vmatprep.subr.bf16.mxu1 %v1486_v13 }
  0x6f   :  { %902 = vmatpush1.bf16.msra.mxu0 %v1460_v19  ;;  %v1493_v19 = vld [vmem:[#allocation11 + $0x120] ss:$12 sps:$4 sm:$0xff]  }
  0x70   :  { %903 = vmatprep.subr.bf16.mxu0 %v1461_v20  ;;  %v1494_v20 = vld [vmem:[#allocation11 + $0x10c] ss:$12 sps:$4 sm:$0xff]  }
  0x71   :  { %939 = vmatpush1.bf16.msra.mxu1 %v1484_v14 }
  0x72   :  { %940 = vmatprep.subr.bf16.mxu1 %v1492_v17 }
  0x73   :  { %904 = vmatpush1.bf16.msra.mxu0 %v1463_v21  ;;  %v1498_v21 = vld [vmem:[#allocation11 + $0x1b4] ss:$12 sps:$4 sm:$0xff]  }
  0x74   :  { %905 = vmatprep.subr.bf16.mxu0 %v1464_v63 }
  0x75   :  { %941 = vmatpush1.bf16.msra.mxu1 %v1490_v18 }
  0x76   :  { %942 = vmatprep.subr.bf16.mxu1 %v1498_v21  ;;  %v1519_v21 = vld [vmem:[#allocation11 + $0xb0] ss:$12 sps:$4 sm:$0xff]  }
  0x77   :  { %906 = vmatpush1.bf16.msra.mxu0 %v1469_v3 }
  0x78   :  { %907 = vmatprep.subr.bf16.mxu0 %v1470_v4 }
  0x79   :  { %943 = vmatpush1.bf16.msra.mxu1 %v1496_v22  ;;  %v1520_v22 = vld [vmem:[#allocation11 + $0x230] ss:$12 sps:$4 sm:$0xff]  }
  0x7b   :  { %908 = vmatpush2.bf16.msra.mxu0 %v1475_v7 }
  0x7c   :  { %909 = vmatprep.subr.bf16.mxu0 %v1476_v8 }
  0x7f   :  { %910 = vmatpush2.bf16.msra.mxu0 %v1481_v11 }
  0x80   :  { %911 = vmatprep.subr.bf16.mxu0 %v1482_v12 }
  0x83   :  { %912 = vmatpush2.bf16.msra.mxu0 %v1487_v15 }
  0x84   :  { %913 = vmatprep.subr.bf16.mxu0 %v1488_v16 }
  0x87   :  { %914 = vmatpush2.bf16.msra.mxu0 %v1493_v19 }
  0x88   :  { %915 = vmatprep.subr.bf16.mxu0 %v1494_v20 }
  0x8b   :  { %916 = vmatpush2.bf16.msra.mxu0 %v1499_v26  ;;  %v1521_v26 = vld [vmem:[#allocation11 + $0x158] ss:$12 sps:$4 sm:$0xff]  }
 0x11c   :  { %v223_v29 = vpop.f32.mrf.mxu1 }
 0x11d   :  { %v1830_v32 = vadd.f32 %v223_v29, %v148_v27  ;;  %v1500_v27 = vld [vmem:[#allocation11 + $0xf4] ss:$12 sps:$4 sm:$0xff]   ;;  %v1502_v29 = vld [vmem:[#allocation11 + $0x198] ss:$12 sps:$4 sm:$0xff]  }
 0x11e   :  { %v225_v31 = vpop.f32.mrf.mxu1  ;;  %917 = vmatprep.subr.bf16.mxu0 %v1500_v27  ;;  %v1522_v27 = vld [vmem:[#allocation11 + $0x98] ss:$12 sps:$4 sm:$0xff]  }
 0x11f   :  { %v1832_v33 = vadd.f32 %v225_v31, %v152_v28  ;;  %v286_v39 = vmul.f32 %v1830_v32, %v1830_v32  ;;  %v274_v44 = vsel %vm273_vm1, %v1830_v32, 0.0  ;;  %v1504_v28 = vld [vmem:[#allocation11 + $0x19c] ss:$12 sps:$4 sm:$0xff]  }
 0x120   :  { %v227_v35 = vpop.f32.mrf.mxu1  ;;  %v1505_v31 = vld [vmem:[#allocation11 + $0xf0] ss:$12 sps:$4 sm:$0xff]   ;;  %944 = vmatprep.subr.bf16.mxu1 %v1504_v28  ;;  %v1523_v28 = vld [vmem:[#allocation11 + $0x218] ss:$12 sps:$4 sm:$0xff]  }
 0x121   :  { %v287_v36 = vmul.f32 %v1832_v33, %v1832_v33  ;;  %v275_v41 = vsel %vm273_vm1, %v1832_v33, 0.0  ;;  %v290_v51 = vsel %vm273_vm1, %v286_v39, 0.0  ;;  %v1506_v35 = vld [vmem:[#allocation11 + $0xdc] ss:$12 sps:$4 sm:$0xff]   ;;  %918 = vmatpush2.bf16.msra.mxu0 %v1505_v31  ;;  %945 = vmatpush1.bf16.msra.mxu1 %v1502_v29  ;;  %v1512_v39 = vld [vmem:[#allocation11 + $0xc4] ss:$12 sps:$4 sm:$0xff]  }
 0x122   :  { %v228_v38 = vpop.f32.mrf.mxu1  ;;  %v276_v47 = vadd.f32 %v275_v41, %v274_v44  ;;  %919 = vmatprep.subr.bf16.mxu0 %v1506_v35  ;;  %v1514_v41 = vld [vmem:[#allocation11 + $0x240] ss:$12 sps:$4 sm:$0xff]   ;;  %v1518_v44 = vld [vmem:[#allocation11 + $0x170] ss:$12 sps:$4 sm:$0xff]  }
 0x123   :  { %v291_v45 = vsel %vm273_vm1, %v287_v36, 0.0  ;;  %v1510_v36 = vld [vmem:[#allocation11 + $0x184] ss:$12 sps:$4 sm:$0xff]   ;;  %v1524_v29 = vld [vmem:[#allocation11 + $0x140] ss:$12 sps:$4 sm:$0xff]  }
 0x124   :  { %v264_v42 = vpop.f32.mrf.mxu1  ;;  %v292_v54 = vadd.f32 %v291_v45, %v290_v51  ;;  %v1511_v38 = vld [vmem:[#allocation11 + $0xd8] ss:$12 sps:$4 sm:$0xff]   ;;  %946 = vmatprep.subr.bf16.mxu1 %v1510_v36  ;;  %v1525_v31 = vld [vmem:[#allocation11 + $0x80] ss:$12 sps:$4 sm:$0xff]   ;;  %v1527_v36 = vld [vmem:[#allocation11 + $0x128] ss:$12 sps:$4 sm:$0xff]  }
 0x125   :  { %v1845_v43 = vadd.f32 %v264_v42, %v156_v37  ;;  %v1508_v37 = vld [vmem:[#allocation11 + $0x180] ss:$12 sps:$4 sm:$0xff]   ;;  %920 = vmatpush2.bf16.msra.mxu0 %v1511_v38  ;;  %v1529_v38 = vld [vmem:[#allocation11 + $0x1e8] ss:$12 sps:$4 sm:$0xff]  }
 0x126   :  { %v266_v46 = vpop.f32.mrf.mxu1  ;;  %947 = vmatpush1.bf16.msra.mxu1 %v1508_v37  ;;  %v1517_v42 = vld [vmem:[#allocation11 + $0xc0] ss:$12 sps:$4 sm:$0xff]   ;;  %921 = vmatprep.subr.bf16.mxu0 %v1512_v39  ;;  %v1528_v37 = vld [vmem:[#allocation11 + $0x68] ss:$12 sps:$4 sm:$0xff]   ;;  %v1530_v39 = vld [vmem:[#allocation11 + $0x110] ss:$12 sps:$4 sm:$0xff]  }
 0x127   :  { %v288_v48 = vmul.f32 %v1845_v43, %v1845_v43  ;;  %v1852_v49 = vadd.f32 %v266_v46, %v160_v40  ;;  %v277_v50 = vsel %vm273_vm1, %v1845_v43, 0.0  ;;  %v1516_v40 = vld [vmem:[#allocation11 + $0x244] ss:$12 sps:$4 sm:$0xff]   ;;  %v1526_v35 = vld [vmem:[#allocation11 + $0x200] ss:$12 sps:$4 sm:$0xff]  }
 0x128   :  { %v268_v52 = vpop.f32.mrf.mxu1  ;;  %v278_v53 = vadd.f32 %v277_v50, %v276_v47  ;;  %962 = vmatprep.subr.bf16.mxu1 %v1516_v40  ;;  %v1531_v40 = vld [vmem:[#allocation11 + $0x50] ss:$12 sps:$4 sm:$0xff]  }
 0x129   :  { %v280_v55 = vsel %vm279_vm2, %v1852_v49, 0.0  ;;  %v289_v56 = vmul.f32 %v1852_v49, %v1852_v49  ;;  %v293_v57 = vsel %vm273_vm1, %v288_v48, 0.0  ;;  %922 = vmatpush2.bf16.msra.mxu0 %v1517_v42  ;;  %v1533_v42 = vld [vmem:[#allocation11 + $0xf8] ss:$12 sps:$4 sm:$0xff]  }
 0x12a   :  { %v269_v58 = vpop.f32.mrf.mxu1  ;;  %v281_v59 = vadd.f32 %v280_v55, %v278_v53  ;;  %v294_v60 = vadd.f32 %v293_v57, %v292_v54  ;;  %963 = vmatpush2.bf16.msra.mxu1 %v1514_v41  ;;  %1013 = vmatprep.subr.bf16.mxu0 %v1707_v1  ;;  %v271_v54 = vld [vmem:[#allocation8] sm:$0xf]  ;;  %v272_v55 = vld [vmem:[#allocation10] sm:$0xf] }
 0x12b   :  { %v295_v61 = vsel %vm279_vm2, %v289_v56, 0.0  ;;  %1392 = vmatprep.subr.bf16.mxu1 %v1518_v44  ;;  %v321_v56 = vrot.slane %v271_v54, %v1820_v25  ;;  %v329_v57 = vrot.slane %v271_v54, %v1835_v34  ;;  %v317_v58 = vrot.slane %v271_v54, %v1817_v24  ;;  %v1532_v41 = vld [vmem:[#allocation11 + $0x1d0] ss:$12 sps:$4 sm:$0xff]   ;;  %v1534_v44 = vld [vmem:[#allocation11 + $0x38] ss:$12 sps:$4 sm:$0xff]  }
 0x12c   :  { %282 = vadd.xlane.f32.xlu0 %v281_v59  ;;  %v296_v62 = vadd.f32 %v295_v61, %v294_v60  ;;  %v325_v59 = vrot.slane %v271_v54, %v1828_v30  ;;  %v346_v2 = vrot.slane %v272_v55, %v1820_v25  ;;  %v354_v3 = vrot.slane %v272_v55, %v1835_v34 }
 0x12d   :  { %v342_v4 = vrot.slane %v272_v55, %v1817_v24  ;;  %v350_v5 = vrot.slane %v272_v55, %v1828_v30  ;;  %v1708_v54 = vmov 1983009808  }
 0x12e   :  { %v1146_v55 = vunpack.c.l.s4 %v1708_v54 }
 0x130   :  { %297 = vadd.xlane.f32.xlu0 %v296_v62 }
 0x1b5   :  { %v283_v45 = vpop.xlane.xlu0 %282 }
 0x1b6   :  { %v285_v46 = vmul.f32 0.0025, %v283_v45  ;;  %v1535_v45 = vld [vmem:[#allocation11 + $0x1b8] ss:$12 sps:$4 sm:$0xff]  }
 0x1b8   :  { %v300_v48 = vmul.f32 %v285_v46, %v285_v46  ;;  %v305_v60 = vsub.f32 %v1845_v43, %v285_v46  ;;  %v306_v61 = vsub.f32 %v1852_v49, %v285_v46  ;;  %v304_v62 = vsub.f32 %v1832_v33, %v285_v46 }
 0x1b9   :  { %v298_v47 = vpop.xlane.xlu0 %297  ;;  %v303_v63 = vsub.f32 %v1830_v32, %v285_v46  ;;  %v1536_v46 = vld [vmem:[#allocation11 + $0xe0] ss:$12 sps:$4 sm:$0xff]  }
 0x1ba   :  { %v299_v50 = vmul.f32 0.0025, %v298_v47  ;;  %v1537_v47 = vld [vmem:[#allocation11 + $0x20] ss:$12 sps:$4 sm:$0xff]  }
 0x1bc   :  { %v301_v51 = vsub.f32 %v299_v50, %v300_v48  ;;  %v1538_v48 = vld [vmem:[#allocation11 + $0x1a0] ss:$12 sps:$4 sm:$0xff]   ;;  %v1539_v50 = vld [vmem:[#allocation11 + $0xc8] ss:$12 sps:$4 sm:$0xff]  }
 0x1be   :  { %v302_v52 = vmax.f32 %v301_v51, 0.0  ;;  %v1540_v51 = vld [vmem:[#allocation11 + $0x8] ss:$12 sps:$4 sm:$0xff]  }
 0x1c0   :  { %v307_v53 = vadd.f32 1e-05, %v302_v52  ;;  %v1541_v52 = vld [vmem:[#allocation11 + $0x188] ss:$12 sps:$4 sm:$0xff]  }
 0x1c2   :  { %1544 = vrsqrt.f32 %v307_v53  ;;  %v1542_v53 = vld [vmem:[#allocation11 + $0x248] ss:$12 sps:$4 sm:$0xff]  }
 0x1cf   :  { %v1545_v0 = vpop.eup %1544 }
 0x1d0   :  { %v310_v6 = vmul.f32 %v1545_v0, %v304_v62  ;;  %v312_v7 = vmul.f32 %v1545_v0, %v306_v61  ;;  %v309_v8 = vmul.f32 %v1545_v0, %v303_v63  ;;  %v311_v9 = vmul.f32 %v1545_v0, %v305_v60  ;;  %v137_v62 = vld [vmem:[#allocation5] sm:$0x3] }
 0x1d1   :  { %v1709_v0 = vmov 0.0  }
 0x1d2   :  { %v335_v43 = vmul.f32 %v321_v56, %v310_v6  ;;  %v337_v10 = vmul.f32 %v329_v57, %v312_v7  ;;  %v334_v49 = vmul.f32 %v317_v58, %v309_v8  ;;  %v336_v11 = vmul.f32 %v325_v59, %v311_v9  ;;  %v1125_v58 = vld [vmem:[%s1951_s10] sm:$0x3f] }
 0x1d3   :  { %v1147_v56 = vunpack.c.0.s8 %v1146_v55  ;;  %v1144_v63 = vcombine.high %v1125_v58, %v1125_v58 }
 0x1d4   :  { %v360_v33 = vadd.f32 %v346_v2, %v335_v43  ;;  %v362_v12 = vadd.f32 %v354_v3, %v337_v10  ;;  %v359_v32 = vadd.f32 %v342_v4, %v334_v49  ;;  %v361_v13 = vadd.f32 %v350_v5, %v336_v11  ;;  %v471_v10 = vld [vmem:[%s1948_s7] sm:$0x7] }
 0x1d5   :  { %v1150_v57 = vsub.s32 %v1147_v56, %v1814_v23  ;;  %v480_v49 = vrot.slane %v471_v10, %v1820_v25  ;;  %v476_v11 = vrot.slane %v471_v10, %v1817_v24 }
 0x1d6   :  { %v364_v14 = vmax.f32 %v360_v33, 0.0  ;;  %v366_v15 = vmax.f32 %v362_v12, 0.0  ;;  %v363_v16 = vmax.f32 %v359_v32, 0.0  ;;  %v365_v34 = vmax.f32 %v361_v13, 0.0 }
 0x1d7   :  { %v1151_v59 = vrot.slane %v1125_v58, %v1150_v57  ;;  %v1158_v23 = vrot.slane %v1144_v63, %v1150_v57  ;;  %v1054_v63 = vld [vmem:[#allocation13] sm:$0x7] }
 0x1d8   :  { %v368_v17 = vpack.c.bf16 %v364_v14, %v364_v14  ;;  %v370_v18 = vpack.c.bf16 %v366_v15, %v366_v15  ;;  %v367_v19 = vpack.c.bf16 %v363_v16, %v363_v16  ;;  %v1874_v20 = vpack.c.bf16 %v365_v34, %v365_v34 }
 0x1d9   :  { %v1159_v60 = vcombine.high %v1151_v59, %v1151_v59  ;;  %v1165_v61 = vsel %vm273_vm1, %v1151_v59, 0  ;;  %v1171_v2 = vsel %vm273_vm1, %v1158_v23, 0  ;;  %v484_v14 = vrot.slane %v471_v10, %v1828_v30 }
 0x1da   :  { %923 = vmatprep.mubr.bf16.mxu0 %v368_v17  ;;  %1386 = vmatprep.mubr.msk.bf16.mxu1 %vm185_vm0, %v370_v18  ;;  %v1114_v10 = vrot.slane %v1054_v63, %v1820_v25 }
 0x1db   :  { %924 = vmatmul.mubr.bf16.vlgmr.msra.gmra.mxu0 %v367_v19  ;;  %965 = vmatmul.mubr.bf16.vlgmr.msra.gmra.mxu1 %v1874_v20 }
 0x1dc   :  { %1393 = vmatpush3.bf16.msra.mxu1 %v1519_v21  ;;  %1014 = vmatpush1.bf16.msra.mxu0 %v1520_v22 }
 0x1dd   :  { %1005 = vmatprep.mubr.bf16.mxu1 %v368_v17  ;;  %1387 = vmatprep.mubr.msk.bf16.mxu0 %vm185_vm0, %v370_v18 }
 0x1de   :  { %1394 = vmatprep.subr.bf16.mxu1 %v1521_v26  ;;  %1015 = vmatprep.subr.bf16.mxu0 %v1707_v1 }
 0x1e0   :  { %1395 = vmatpush3.bf16.msra.mxu1 %v1522_v27  ;;  %1016 = vmatpush1.bf16.msra.mxu0 %v1523_v28 }
 0x1e1   :  { %1396 = vmatprep.subr.bf16.mxu1 %v1524_v29  ;;  %1017 = vmatprep.subr.bf16.mxu0 %v1707_v1 }
 0x1e4   :  { %1397 = vmatpush3.bf16.msra.mxu1 %v1525_v31  ;;  %1018 = vmatpush1.bf16.msra.mxu0 %v1526_v35 }
 0x1e5   :  { %1398 = vmatprep.subr.bf16.mxu1 %v1527_v36  ;;  %1019 = vmatprep.subr.bf16.mxu0 %v1707_v1 }
 0x1e8   :  { %1399 = vmatpush3.bf16.msra.mxu1 %v1528_v37  ;;  %1020 = vmatpush1.bf16.msra.mxu0 %v1529_v38 }
 0x1e9   :  { %1400 = vmatprep.subr.bf16.mxu1 %v1530_v39  ;;  %1021 = vmatprep.subr.bf16.mxu0 %v1707_v1 }
 0x1ec   :  { %1401 = vmatpush3.bf16.msra.mxu1 %v1531_v40  ;;  %1022 = vmatpush1.bf16.msra.mxu0 %v1532_v41 }
 0x1ed   :  { %1402 = vmatprep.subr.bf16.mxu1 %v1533_v42  ;;  %1023 = vmatprep.subr.bf16.mxu0 %v1707_v1 }
 0x1f0   :  { %1403 = vmatpush3.bf16.msra.mxu1 %v1534_v44  ;;  %1024 = vmatpush1.bf16.msra.mxu0 %v1535_v45 }
 0x1f1   :  { %1404 = vmatprep.subr.bf16.mxu1 %v1536_v46  ;;  %1025 = vmatprep.subr.bf16.mxu0 %v1707_v1 }
 0x1f4   :  { %1405 = vmatpush3.bf16.msra.mxu1 %v1537_v47  ;;  %1026 = vmatpush1.bf16.msra.mxu0 %v1538_v48 }
 0x1f5   :  { %1406 = vmatprep.subr.bf16.mxu1 %v1539_v50  ;;  %1027 = vmatprep.subr.bf16.mxu0 %v1707_v1 }
 0x1f8   :  { %1407 = vmatpush3.bf16.msra.mxu1 %v1540_v51  ;;  %1028 = vmatpush1.bf16.msra.mxu0 %v1541_v52 }
 0x1f9   :  { %1043 = vmatprep.subr.bf16.mxu0 %v1707_v1  ;;  %1388 = vmatprep.subr.msk.bf16.mxu1 %vm273_vm1, %v1159_v60 }
 0x1fb   :  { %1006 = vmatmul.mubr.bf16.vlgmr.msra.gmra.mxu1 %v367_v19 }
 0x1fc   :  { %1044 = vmatpush2.bf16.msra.mxu0 %v1542_v53  ;;  %1205 = vmatprep.mubr.bf16.mxu1 %v1707_v1  ;;  %v138_v1 = vpack.c.bf16 %v137_v62, %v137_v62 }
 0x1fd   :  { %1188 = vmatpush1.bf16.msra.mxu1 %v1165_v61 }
 0x1fe   :  { %1416 = vmatprep.subr.bf16.mxu1 %v1709_v0 }
 0x1ff   :  { %1046 = vmatmul.mubr.bf16.vlgmr.msra.gmra.mxu0 %v1874_v20 }
 0x203   :  { %1389 = vmatmul.mubr.msk.bf16.vlgmr.msra.gmra.mxu1 %vm1160_vm3, %v138_v1 }
 0x204   :  { %1418 = vmatprep.mubr.msk.bf16.mxu1 %vm1710_vm4, %v1709_v0  ;;  %1417 = vmatpush3.bf16.msra.mxu1 %v1171_v2  ;;  %v1126_v0 = vld [vmem:[%s1952_s11] sm:$0x7] }
 0x20b   :  { %1419 = vmatmul.mubr.msk.bf16.vlgmr.msra.gmra.mxu1 %vm1160_vm3, %v138_v1  ;;  %v1053_v1 = vld [vmem:[%s1949_s8] sm:$0x7] }
 0x20c   :  { %v1091_v23 = vrot.slane %v1053_v1, %v1817_v24  ;;  %v1095_v2 = vrot.slane %v1053_v1, %v1820_v25 }
 0x29b   :  { %v925_v3 = vpop.f32.mrf.mxu0  ;;  %v966_v4 = vpop.f32.mrf.mxu1 }
 0x29c   :  { %v926_v12 = vadd.f32 %v925_v3, %v476_v11  ;;  %v1099_v3 = vrot.slane %v1053_v1, %v1828_v30 }
 0x29d   :  { %v927_v5 = vpop.f32.mrf.mxu0  ;;  %v968_v6 = vpop.f32.mrf.mxu1 }
 0x29e   :  { %v928_v33 = vadd.f32 %v927_v5, %v480_v49  ;;  %v967_v16 = vadd.f32 %v966_v4, %v926_v12  ;;  %v1135_v49 = vrot.slane %v1126_v0, %v1820_v25 }
 0x29f   :  { %v929_v7 = vpop.f32.mrf.mxu0  ;;  %v970_v8 = vpop.f32.mrf.mxu1 }
 0x2a0   :  { %v1901_v13 = vadd.f32 %v968_v6, %v928_v33  ;;  %v1065_v27 = vmul.f32 %v967_v16, %v967_v16  ;;  %v1055_v29 = vsel %vm273_vm1, %v967_v16, 0.0  ;;  %v1139_v7 = vrot.slane %v1126_v0, %v1828_v30 }
 0x2a1   :  { %v930_v9 = vpop.f32.mrf.mxu0  ;;  %v971_v43 = vpop.f32.mrf.mxu1 }
 0x2a2   :  { %v1066_v19 = vmul.f32 %v1901_v13, %v1901_v13  ;;  %v1056_v21 = vsel %vm273_vm1, %v1901_v13, 0.0  ;;  %v1068_v41 = vsel %vm273_vm1, %v1065_v27, 0.0  ;;  %v1110_v9 = vrot.slane %v1054_v63, %v1817_v24 }
 0x2a3   :  { %v1057_v35 = vadd.f32 %v1056_v21, %v1055_v29  ;;  %v1131_v43 = vrot.slane %v1126_v0, %v1817_v24 }
 0x2a4   :  { %v1069_v38 = vsel %vm273_vm1, %v1066_v19, 0.0 }
 0x2a5   :  { %v1070_v44 = vadd.f32 %v1069_v38, %v1068_v41 }
 0x2bb   :  { %v1408_v32 = vpop.f32.mrf.mxu1 }
 0x2bd   :  { %v1409_v15 = vpop.f32.mrf.mxu1 }
 0x2be   :  { %v1410_v34 = vadd.f32 %v1409_v15, %v1408_v32  ;;  %v1118_v32 = vrot.slane %v1054_v63, %v1828_v30 }
 0x2bf   :  { %v1411_v17 = vpop.f32.mrf.mxu1  ;;  %v1047_v18 = vpop.f32.mrf.mxu0 }
 0x2c0   :  { %v1008_v20 = vadd.f32 %v1410_v34, %v484_v14 }
 0x2c1   :  { %v1412_v22 = vpop.f32.mrf.mxu1  ;;  %v1049_v26 = vpop.f32.mrf.mxu0 }
 0x2c2   :  { %v1048_v28 = vadd.f32 %v1047_v18, %v1008_v20 }
 0x2c3   :  { %v1050_v31 = vpop.f32.mrf.mxu0  ;;  %v1207_v46 = vpop.f32.mrf.mxu1 }
 0x2c4   :  { %v1059_v36 = vsel %vm1058_vm5, %v1048_v28, 0.0  ;;  %v1067_v37 = vmul.f32 %v1048_v28, %v1048_v28  ;;  %v1208_v17 = vadd.f32 %v1207_v46, %v1131_v43 }
 0x2c5   :  { %v1051_v39 = vpop.f32.mrf.mxu0  ;;  %v1060_v40 = vadd.f32 %v1059_v36, %v1057_v35  ;;  %v1209_v47 = vpop.f32.mrf.mxu1 }
 0x2c6   :  { %v1071_v42 = vsel %vm1058_vm5, %v1067_v37, 0.0  ;;  %v1210_v20 = vadd.f32 %v1209_v47, %v1135_v49 }
 0x2c7   :  { %1061 = vadd.xlane.f32.xlu1 %v1060_v40  ;;  %v1072_v45 = vadd.f32 %v1071_v42, %v1070_v44  ;;  %v1211_v48 = vpop.f32.mrf.mxu1 }
 0x2c9   :  { %v1212_v50 = vpop.f32.mrf.mxu1 }
 0x2cb   :  { %1073 = vadd.xlane.f32.xlu1 %v1072_v45  ;;  %v1248_v51 = vpop.f32.mrf.mxu1 }
 0x2cc   :  { %v1249_v34 = vadd.f32 %v1248_v51, %v1139_v7 }
 0x2cd   :  { %v1420_v52 = vpop.f32.mrf.mxu1 }
 0x2cf   :  { %v1251_v53 = vpop.f32.mrf.mxu1 }
 0x2d1   :  { %v1421_v54 = vpop.f32.mrf.mxu1 }
 0x350   :  { %v1062_v55 = vpop.xlane.xlu1 %1061 }
 0x351   :  { %v1064_v56 = vmul.f32 0.0033333334, %v1062_v55 }
 0x353   :  { %v1076_v58 = vmul.f32 %v1064_v56, %v1064_v56  ;;  %v1079_v4 = vsub.f32 %v967_v16, %v1064_v56  ;;  %v1080_v5 = vsub.f32 %v1901_v13, %v1064_v56  ;;  %v1081_v6 = vsub.f32 %v1048_v28, %v1064_v56  ;;  %v1260_v13 = vld [vmem:[%s1953_s12] sm:$0x7] }
 0x354   :  { %v1074_v57 = vpop.xlane.xlu1 %1073  ;;  %v1265_v22 = vrot.slane %v1260_v13, %v1817_v24  ;;  %v1269_v26 = vrot.slane %v1260_v13, %v1820_v25  ;;  %v1273_v31 = vrot.slane %v1260_v13, %v1828_v30  ;;  %v1391_v25 = vld [vmem:[#allocation2] ss:$0 sm:$0xff] }
 0x355   :  { %v1075_v59 = vmul.f32 0.0033333334, %v1074_v57 }
 0x357   :  { %v1077_v60 = vsub.f32 %v1075_v59, %v1076_v58 }
 0x359   :  { %v1078_v61 = vmax.f32 %v1077_v60, 0.0 }
 0x35b   :  { %v1082_v62 = vadd.f32 1e-05, %v1078_v61 }
 0x35d   :  { %1546 = vrsqrt.f32 %v1082_v62 }
 0x36a   :  { %v1547_v8 = vpop.eup %1546 }
 0x36b   :  { %v1084_v11 = vmul.f32 %v1547_v8, %v1079_v4  ;;  %v1085_v33 = vmul.f32 %v1547_v8, %v1080_v5  ;;  %v1086_v12 = vmul.f32 %v1547_v8, %v1081_v6 }
 0x36d   :  { %v1103_v14 = vmul.f32 %v1091_v23, %v1084_v11  ;;  %v1104_v15 = vmul.f32 %v1095_v2, %v1085_v33  ;;  %v1105_v16 = vmul.f32 %v1099_v3, %v1086_v12 }
 0x36f   :  { %v1122_v18 = vadd.f32 %v1110_v9, %v1103_v14  ;;  %v1123_v19 = vadd.f32 %v1114_v10, %v1104_v15  ;;  %v1124_v21 = vadd.f32 %v1118_v32, %v1105_v16 }
 0x371   :  { %v1254_v27 = vadd.f32 %v1208_v17, %v1122_v18  ;;  %v1255_v28 = vadd.f32 %v1210_v20, %v1123_v19  ;;  %v1256_v29 = vadd.f32 %v1249_v34, %v1124_v21 }
 0x373   :  { %v1257_v35 = vmax.f32 %v1254_v27, 0.0  ;;  %v1258_v36 = vmax.f32 %v1255_v28, 0.0  ;;  %v1259_v37 = vmax.f32 %v1256_v29, 0.0 }
 0x375   :  { %v1277_v38 = vmul.f32 %v1265_v22, %v1257_v35  ;;  %v1278_v39 = vmul.f32 %v1269_v26, %v1258_v36  ;;  %v1279_v40 = vmul.f32 %v1273_v31, %v1259_v37 }
 0x377   :  { %v1280_v41 = vsel %vm273_vm1, %v1277_v38, 0.0  ;;  %v1281_v42 = vsel %vm273_vm1, %v1278_v39, 0.0  ;;  %v1283_v24 = vsel %vm1058_vm5, %v1279_v40, 0.0 }
 0x378   :  { %v1282_v44 = vadd.f32 %v1281_v42, %v1280_v41 }
 0x37a   :  { %v1284_v45 = vadd.f32 %v1283_v24, %v1282_v44 }
 0x37c   :  { %1285 = vadd.xlane.f32.xlu0 %v1284_v45 }
 0x405   :  { %v1286_v46 = vpop.xlane.xlu0 %1285 }
 0x406   :  { %v1294_v47 = vadd.f32 %v1391_v25, %v1286_v46 }
 0x408   :  { %1296 = vst.msk [vmem:[%s1955_s14] sm:$0x3] %vm1295_vm6, %v1294_v47 }
 0x409   :  { %1301 = vsyncpa [#allocation4], 1 }
 0x40a   :  { %1302 = vsyncpa [#allocation6], 1 }
 0x40b   :  { %1303 = vsyncpa [#allocation9], 1 }
 0x40c   :  { %1304 = vsyncpa [#allocation12], 1 }

</bundles_post_ra>
